<compile_context>
chip_gen: v5e
topology: v5e:2x2
jax: 0.10.0
libtpu: 0.0.40
codegen_flags: <defaults>
</compile_context>

<pallas_src>
from functools import partial

import numpy as np
import jax
import jax.numpy as jnp
from jax.experimental import pallas as pl
from jax.experimental.pallas import tpu as pltpu


def _round_up(x, m):
    return (x + m - 1) // m * m


# ----------------------------- in-kernel helpers -----------------------------
def _dot_hilo(x_f32, w_bf16):
    """f32-accuracy matmul of an f32 activation against an exact-in-bf16 0/1
    matrix using two native bf16 MXU passes (hi/lo split). Faster than one
    emulated f32 matmul on v5e/v6e/v7x, accurate to ~2^-16 relative."""
    hi = x_f32.astype(jnp.bfloat16)
    lo = (x_f32 - hi.astype(jnp.float32)).astype(jnp.bfloat16)
    return (jnp.dot(hi, w_bf16, preferred_element_type=jnp.float32) +
            jnp.dot(lo, w_bf16, preferred_element_type=jnp.float32))


def _group_sum_broadcast(e, grp, grp_t):
    """Per-node sum of e within the node's sibling group:
    (rows, N) -> (rows, NGp) -> (rows, N)."""
    gsum = _dot_hilo(e, grp)
    return _dot_hilo(gsum, grp_t)


def _row_mask(tile_rows, n_rows):
    """Validity mask for the (possibly ragged) last batch tile."""
    row = (jax.lax.broadcasted_iota(jnp.int32, (tile_rows, 1), 0)
           + pl.program_id(0) * tile_rows)
    return row < n_rows


# --------------------------------- kernels ------------------------------------
def _cond_softmax_train_kernel(pred_ref, tgt_ref, la_ref, grp_ref, grpt_ref,
                               loss_ref, *, n_rows):
    tb_rows = pred_ref.shape[0]
    pred = pred_ref[...].astype(jnp.float32)
    tgt = tgt_ref[...].astype(jnp.float32)

    x = pred + la_ref[...]
    # Shared row-max stabiliser across all sibling groups. NOTE: a group whose
    # logits sit ~>80 below the row max underflows and falls back to the
    # where(...)->0 branch; acceptable for realistic logits / class priors.
    m = jnp.max(x, axis=1, keepdims=True)
    shift = x - m
    e = jnp.exp(shift)
    per_node = _group_sum_broadcast(e, grp_ref[...], grpt_ref[...])
    cond = jnp.where(per_node > 0.0,
                     shift - jnp.log(jnp.maximum(per_node, 1e-30)), 0.0)

    per_ex = -jnp.sum(tgt * cond, axis=1, keepdims=True)
    per_ex = jnp.where(_row_mask(tb_rows, n_rows), per_ex, 0.0)
    loss_ref[...] = jnp.full(loss_ref.shape, jnp.sum(per_ex), dtype=jnp.float32)


def _cond_softmax_eval_kernel(pred_ref, tgt_ref, la_ref, prior_ref, grp_ref,
                              grpt_ref, anc_ref, loss_ref, nodes_ref, *, n_rows):
    tb_rows = pred_ref.shape[0]
    pred = pred_ref[...].astype(jnp.float32)
    tgt = tgt_ref[...].astype(jnp.float32)
    la = la_ref[...]            # (1, N) f32, tau*log(probs) <= 0
    prior = prior_ref[...]      # (1, N) f32, exp(la) = probs**tau
    grp = grp_ref[...]          # bf16 0/1, fed straight to the MXU
    grp_t = grpt_ref[...]

    # One shared stabiliser + ONE exp serve both softmaxes (la <= 0 so
    # rowmax(pred) also dominates pred + la).
    m = jnp.max(pred, axis=1, keepdims=True)
    shift = pred - m
    e_old = jnp.exp(shift)
    e_adj = e_old * prior                               # == exp(pred + la - m)

    # Stack old/adjusted rows so the group matmuls run once with 2x the M dim.
    stacked = jnp.concatenate([e_old, e_adj], axis=0)   # (2*TB, N)
    per_node = _group_sum_broadcast(stacked, grp, grp_t)
    pn_old, pn_adj = per_node[:tb_rows], per_node[tb_rows:]

    cond_old = jnp.where(pn_old > 0.0,
                         shift - jnp.log(jnp.maximum(pn_old, 1e-30)), 0.0)
    cond_adj = jnp.where(pn_adj > 0.0,
                         shift + la - jnp.log(jnp.maximum(pn_adj, 1e-30)), 0.0)

    per_ex = -jnp.sum(tgt * cond_adj, axis=1, keepdims=True)
    per_ex = jnp.where(_row_mask(tb_rows, n_rows), per_ex, 0.0)
    loss_ref[...] = jnp.full(loss_ref.shape, jnp.sum(per_ex), dtype=jnp.float32)

    # Level-by-level roll-up == matmul with the ancestor-or-self matrix.
    # Dominant FLOP term in EVAL; runs as 2 native bf16 passes (hi/lo).
    # TODO(synk): for very large taxonomies (N >= ~2k) replace the dense (N,N)
    # ancestor matmul with a per-level accumulation (anc density ~ depth/N).
    path_log = _dot_hilo(cond_old, anc_ref[...])
    nodes_ref[...] = jnp.exp(path_log).astype(nodes_ref.dtype)


# ------------------------------ tiling / VMEM ---------------------------------
def _vmem_capacity_bytes():
    try:
        info = pltpu.get_tpu_info()
        cap = int(getattr(info, "vmem_capacity_bytes", 0) or 0)
        if cap > 0:
            return cap
    except Exception:
        pass
    return 64 * 1024 * 1024      # conservative fallback (v7x physical VMEM)


def _derive_tiling(B, N, NGp, eval_mode, tb_request):
    """Pick a batch tile TB and a VMEM limit per TPU generation."""
    cap = _vmem_capacity_bytes()
    # single-buffered constants (bf16 grp/grp_t[/anc], f32 la/prior)
    const_bytes = 2 * N * NGp * 2 + (N * N * 2 if eval_mode else 0) + 2 * N * 4
    # per-batch-row working set: double-buffered pred/tgt (+nodes out in EVAL)
    # plus f32 temporaries (exp/cond/hi-lo splits/group sums), upper bound.
    per_row = (2 + 2) * N * 4
    if eval_mode:
        per_row += 2 * N * 4 + 12 * N * 4 + 4 * NGp * 4
    else:
        per_row += 8 * N * 4 + 2 * NGp * 4
    budget = int(cap * 0.6)
    avail = max(budget - const_bytes, per_row * 8)
    tb_fit = max(8, (avail // per_row) // 8 * 8)

    tb_cap = 512 if tb_request is None else max(8, int(tb_request))
    tb = min(tb_fit, tb_cap, _round_up(B, 8))
    if B >= 16:   # keep >=2 grid steps so both v7x TensorCores get work
        tb = min(tb, _round_up(pl.cdiv(B, 2), 8))
    tb = max(8, tb)
    num_tiles = pl.cdiv(B, tb)
    vmem_limit = max(32 * 1024 * 1024, int(cap * 3 // 4))   # 96 MiB v5e/v6e, 48 MiB v7x
    return tb, num_tiles, vmem_limit


# ------------------------------- JAX wrapper ----------------------------------
def conditional_softmax_forward(pred, target, hier, mode="EVAL", tb=None):
    """Mirrors ConditionalSoftmaxWithLogitAdjustment.forward.
    Returns (loss, pred_clone); pred_clone is None when mode == 'TRAIN'."""
    la = hier["logit_adjustment"]    # (1, N) f32
    prior = hier["prior"]            # (1, N) f32
    grp = hier["grp"]                # (N, NGp) bf16
    grp_t = hier["grp_t"]            # (NGp, N) bf16
    anc = hier["anc"]                # (N, N) bf16

    B, N = pred.shape
    assert N == hier["n_nodes"]
    NGp = grp.shape[1]
    eval_mode = (mode != "TRAIN")

    TB, num_tiles, vmem_limit = _derive_tiling(B, N, NGp, eval_mode, tb)

    row_spec = pl.BlockSpec((TB, N), lambda i: (i, 0))

    def const_spec(shape):
        nd = len(shape)
        # constant block index never changes -> single-buffered (no wasted VMEM)
        return pl.BlockSpec(shape, lambda i: (0,) * nd,
                            pipeline_mode=pl.Buffered(1))

    loss_spec = pl.BlockSpec((1, 8, 128), lambda i: (i, 0, 0))   # lane-dense

    params = pltpu.CompilerParams(
        dimension_semantics=("parallel",),      # independent batch tiles
        vmem_limit_bytes=int(vmem_limit),
    )

    if not eval_mode:
        cost = pl.CostEstimate(
            flops=int(8 * B * N * NGp),
            transcendentals=int(2 * B * N),
            bytes_accessed=int(2 * B * N * 4 + 2 * N * NGp * 2))
        loss_parts = pl.pallas_call(
            partial(_cond_softmax_train_kernel, n_rows=B),
            out_shape=jax.ShapeDtypeStruct((num_tiles, 8, 128), jnp.float32),
            grid=(num_tiles,),
            in_specs=[row_spec, row_spec, const_spec((1, N)),
                      const_spec((N, NGp)), const_spec((NGp, N))],
            out_specs=loss_spec,
            compiler_params=params,
            cost_estimate=cost,
        )(pred, target, la, grp, grp_t)
        loss = jnp.sum(loss_parts[:, 0, 0]) / B       # divide by the TRUE batch
        return loss, None

    cost = pl.CostEstimate(
        flops=int(16 * B * N * NGp + 4 * B * N * N),
        transcendentals=int(3 * B * N),
        bytes_accessed=int(3 * B * N * 4 + 2 * N * NGp * 2 + N * N * 2))
    loss_parts, nodes = pl.pallas_call(
        partial(_cond_softmax_eval_kernel, n_rows=B),
        out_shape=(jax.ShapeDtypeStruct((num_tiles, 8, 128), jnp.float32),
                   jax.ShapeDtypeStruct((B, N), jnp.float32)),
        grid=(num_tiles,),
        in_specs=[row_spec, row_spec, const_spec((1, N)), const_spec((1, N)),
                  const_spec((N, NGp)), const_spec((NGp, N)),
                  const_spec((N, N))],
        out_specs=(loss_spec, row_spec),
        compiler_params=params,
        cost_estimate=cost,
    )(pred, target, la, prior, grp, grp_t, anc)
    loss = jnp.sum(loss_parts[:, 0, 0]) / B
    return loss, nodes


# ------------------- hierarchy constants (host-side, once) -------------------
def build_hierarchy_constants(recursive_relation, levels, n_nodes, probs,
                              tau=1.0, group_pad=256):
    """Fold the per-group / per-level Python loops of the PyTorch module into
    constant 0/1 matrices so the kernel only runs matmuls.

    grp[n, g] = 1 iff node n belongs to sibling group g.
    anc[a, n] = coefficient of old[:, a] in the reference roll-up of node n
                (ancestor-or-self indicator for a tree).
    The node axis is intentionally NOT padded, so pred/target never need a
    host-side pad copy (Mosaic pads unaligned dims internally).  The group
    axis is padded to `group_pad` lanes (256 fills the v6e/v7x MXU tile;
    use 128 on v5e)."""
    keys = list(recursive_relation.keys())
    N = n_nodes
    NGp = _round_up(max(len(keys), 1), group_pad)

    grp = np.zeros((N, NGp), dtype=np.float32)
    for g, key in enumerate(keys):
        for child in recursive_relation[key]:
            grp[child, g] = 1.0

    # Exact simulation of the reference level-by-level roll-up as a coefficient
    # matrix: clone_log[:, n] = sum_a anc[a, n] * old_log[:, a].
    anc = np.eye(N, dtype=np.float32)
    for level in levels:
        for node in levels[level]:
            if node in recursive_relation:
                for child in recursive_relation[node]:
                    col = np.zeros(N, dtype=np.float32)
                    col[child] = 1.0
                    anc[:, child] = col + anc[:, node]

    la = (tau * np.log(np.asarray(probs, dtype=np.float32))).reshape(1, N)
    prior = np.exp(la)      # probs**tau; lets EVAL reuse one exp in-kernel

    return dict(
        logit_adjustment=jnp.asarray(la, dtype=jnp.float32),
        prior=jnp.asarray(prior, dtype=jnp.float32),
        grp=jnp.asarray(grp, dtype=jnp.bfloat16),              # exact 0/1 in bf16
        grp_t=jnp.asarray(np.ascontiguousarray(grp.T), dtype=jnp.bfloat16),
        anc=jnp.asarray(anc, dtype=jnp.bfloat16),
        n_nodes=n_nodes,
    )


# ------------------ pure-numpy reference (mirrors PyTorch) --------------------
def reference_forward(pred, target, recursive_relation, levels, probs,
                      tau=1.0, mode="EVAL"):
    pred = np.asarray(pred, dtype=np.float32)
    target = np.asarray(target, dtype=np.float32)
    la = tau * np.log(np.asarray(probs, dtype=np.float32))

    def log_softmax(x):
        m = x.max(axis=1, keepdims=True)
        return x - m - np.log(np.exp(x - m).sum(axis=1, keepdims=True))

    adj = pred + la[None, :]
    old = pred.copy()
    for key in recursive_relation:
        cols = recursive_relation[key]
        adj[:, cols] = log_softmax(adj[:, cols])
        old[:, cols] = log_softmax(old[:, cols])

    if mode != "TRAIN":
        clone = old.copy()
        for level in levels:
            for node in levels[level]:
                if node in recursive_relation:
                    cols = recursive_relation[node]
                    clone[:, cols] = old[:, cols] + clone[:, [node]]
        clone = np.exp(clone)
    else:
        clone = None

    loss = -(adj * target)
    loss = loss.sum(axis=1).mean()
    return loss, clone


# ------------------------------------ main ------------------------------------
if __name__ == "__main__":
    # small taxonomy: virtual root -1 -> {0, 1}; 0 -> {2, 3}; 1 -> {4, 5, 6}
    recursive_relation = {-1: [0, 1], 0: [2, 3], 1: [4, 5, 6]}
    levels = {0: [0, 1], 1: [2, 3, 4, 5, 6]}
    n_nodes = 7
    tau = 1.0

    key = jax.random.PRNGKey(0)
    k_pred, k_leaf, k_probs = jax.random.split(key, 3)

    probs = np.asarray(jax.random.uniform(k_probs, (n_nodes,),
                                          minval=0.05, maxval=1.0))
    probs = probs / probs.sum()

    hier = build_hierarchy_constants(recursive_relation, levels, n_nodes,
                                     probs, tau=tau)

    B = 64
    pred = jax.random.normal(k_pred, (B, n_nodes), dtype=jnp.float32)

    # deterministic multi-hot ancestor-path targets (one leaf per example)
    leaves = [2, 3, 4, 5, 6]
    parent = {c: p for p, cs in recursive_relation.items() for c in cs if p >= 0}
    leaf_pick = np.asarray(jax.random.randint(k_leaf, (B,), 0, len(leaves)))
    target_np = np.zeros((B, n_nodes), dtype=np.float32)
    for b in range(B):
        node = leaves[int(leaf_pick[b])]
        while True:
            target_np[b, node] = 1.0
            if node not in parent:
                break
            node = parent[node]
    target = jnp.asarray(target_np)

    # EVAL mode: loss + marginal node probabilities (auto batch tiling)
    loss, pred_nodes = conditional_softmax_forward(pred, target, hier,
                                                   mode="EVAL")
    jax.block_until_ready((loss, pred_nodes))

    loss_ref, nodes_ref = reference_forward(pred, target_np, recursive_relation,
                                            levels, probs, tau=tau, mode="EVAL")
    assert np.allclose(np.asarray(loss), loss_ref, atol=1e-4), (loss, loss_ref)
    assert np.allclose(np.asarray(pred_nodes), nodes_ref, atol=1e-4)

    # TRAIN mode: no roll-up matmul, no (B, N) output, pred_clone is None
    loss_tr, none_nodes = conditional_softmax_forward(pred, target, hier,
                                                      mode="TRAIN", tb=16)
    jax.block_until_ready(loss_tr)
    assert none_nodes is None
    assert np.allclose(np.asarray(loss_tr), loss_ref, atol=1e-4)

    print("KERNEL_OK")
</pallas_src>

<mosaic_0001>
module attributes {stable_mosaic.version = 11 : i64} {
  func.func @_cond_softmax_eval_kernel(%arg0: i32, %arg1: memref<32x7xf32, #tpu.memory_space<vmem>>, %arg2: memref<32x7xf32, #tpu.memory_space<vmem>>, %arg3: memref<1x7xf32, #tpu.memory_space<vmem>>, %arg4: memref<1x7xf32, #tpu.memory_space<vmem>>, %arg5: memref<7x256xbf16, #tpu.memory_space<vmem>>, %arg6: memref<256x7xbf16, #tpu.memory_space<vmem>>, %arg7: memref<7x7xbf16, #tpu.memory_space<vmem>>, %arg8: memref<1x8x128xf32, #tpu.memory_space<vmem>>, %arg9: memref<32x7xf32, #tpu.memory_space<vmem>>) attributes {dimension_semantics = [#tpu.dimension_semantics<parallel>], iteration_bounds = array<i64: 2>, scalar_prefetch = 0 : i64, scratch_operands = 0 : i64, tpu.core_type = #tpu.core_type<tc>, window_params = [{transform_indices = @transform_0, window_bounds = array<i64: 32, 7>}, {transform_indices = @transform_1, window_bounds = array<i64: 32, 7>}, {pipeline_mode = #tpu.pipeline_mode<synchronous>, transform_indices = @transform_2, window_bounds = array<i64: 1, 7>}, {pipeline_mode = #tpu.pipeline_mode<synchronous>, transform_indices = @transform_3, window_bounds = array<i64: 1, 7>}, {pipeline_mode = #tpu.pipeline_mode<synchronous>, transform_indices = @transform_4, window_bounds = array<i64: 7, 256>}, {pipeline_mode = #tpu.pipeline_mode<synchronous>, transform_indices = @transform_5, window_bounds = array<i64: 256, 7>}, {pipeline_mode = #tpu.pipeline_mode<synchronous>, transform_indices = @transform_6, window_bounds = array<i64: 7, 7>}, {transform_indices = @transform_7, window_bounds = array<i64: 1, 8, 128>}, {transform_indices = @transform_8, window_bounds = array<i64: 32, 7>}]} {
    %c0 = arith.constant 0 : index
    %c0_0 = arith.constant 0 : index
    %0 = vector.load %arg1[%c0, %c0_0] : memref<32x7xf32, #tpu.memory_space<vmem>>, vector<32x7xf32>
    %c0_1 = arith.constant 0 : index
    %c0_2 = arith.constant 0 : index
    %1 = vector.load %arg2[%c0_1, %c0_2] : memref<32x7xf32, #tpu.memory_space<vmem>>, vector<32x7xf32>
    %c0_3 = arith.constant 0 : index
    %c0_4 = arith.constant 0 : index
    %2 = vector.load %arg3[%c0_3, %c0_4] : memref<1x7xf32, #tpu.memory_space<vmem>>, vector<1x7xf32>
    %c0_5 = arith.constant 0 : index
    %c0_6 = arith.constant 0 : index
    %3 = vector.load %arg4[%c0_5, %c0_6] : memref<1x7xf32, #tpu.memory_space<vmem>>, vector<1x7xf32>
    %c0_7 = arith.constant 0 : index
    %c0_8 = arith.constant 0 : index
    %4 = vector.load %arg5[%c0_7, %c0_8] : memref<7x256xbf16, #tpu.memory_space<vmem>>, vector<7x256xbf16>
    %c0_9 = arith.constant 0 : index
    %c0_10 = arith.constant 0 : index
    %5 = vector.load %arg6[%c0_9, %c0_10] : memref<256x7xbf16, #tpu.memory_space<vmem>>, vector<256x7xbf16>
    %cst = arith.constant dense<0xFF800000> : vector<32xf32>
    %6 = vector.multi_reduction <maximumf>, %0, %cst [1] : vector<32x7xf32> to vector<32xf32>
    %7 = vector.shape_cast %6 : vector<32xf32> to vector<32x1xf32>
    %8 = vector.broadcast %7 : vector<32x1xf32> to vector<32x7xf32>
    %9 = arith.subf %0, %8 : vector<32x7xf32>
    %10 = math.exp %9 : vector<32x7xf32>
    %11 = vector.broadcast %3 : vector<1x7xf32> to vector<32x7xf32>
    %12 = arith.mulf %10, %11 : vector<32x7xf32>
    %13 = tpu.concatenate %10, %12 in 0 : vector<32x7xf32>, vector<32x7xf32> -> vector<64x7xf32>
    %14 = arith.truncf %13 : vector<64x7xf32> to vector<64x7xbf16>
    %15 = arith.extf %14 : vector<64x7xbf16> to vector<64x7xf32>
    %16 = arith.subf %13, %15 : vector<64x7xf32>
    %17 = arith.truncf %16 : vector<64x7xf32> to vector<64x7xbf16>
    %cst_11 = arith.constant dense<0.000000e+00> : vector<64x256xf32>
    %18 = tpu.matmul %14, %4, %cst_11 {dimension_numbers = #tpu.dot_dimension_numbers<[1], [0], [0], [1], [0, 0, 1, 1], [], []>} : vector<64x7xbf16>, vector<7x256xbf16>, vector<64x256xf32> -> vector<64x256xf32>
    %cst_12 = arith.constant dense<0.000000e+00> : vector<64x256xf32>
    %19 = tpu.matmul %17, %4, %cst_12 {dimension_numbers = #tpu.dot_dimension_numbers<[1], [0], [0], [1], [0, 0, 1, 1], [], []>} : vector<64x7xbf16>, vector<7x256xbf16>, vector<64x256xf32> -> vector<64x256xf32>
    %20 = arith.addf %18, %19 : vector<64x256xf32>
    %21 = arith.truncf %20 : vector<64x256xf32> to vector<64x256xbf16>
    %22 = arith.extf %21 : vector<64x256xbf16> to vector<64x256xf32>
    %23 = arith.subf %20, %22 : vector<64x256xf32>
    %24 = arith.truncf %23 : vector<64x256xf32> to vector<64x256xbf16>
    %cst_13 = arith.constant dense<0.000000e+00> : vector<64x7xf32>
    %25 = tpu.matmul %21, %5, %cst_13 {dimension_numbers = #tpu.dot_dimension_numbers<[1], [0], [0], [1], [0, 0, 1, 1], [], []>} : vector<64x256xbf16>, vector<256x7xbf16>, vector<64x7xf32> -> vector<64x7xf32>
    %cst_14 = arith.constant dense<0.000000e+00> : vector<64x7xf32>
    %26 = tpu.matmul %24, %5, %cst_14 {dimension_numbers = #tpu.dot_dimension_numbers<[1], [0], [0], [1], [0, 0, 1, 1], [], []>} : vector<64x256xbf16>, vector<256x7xbf16>, vector<64x7xf32> -> vector<64x7xf32>
    %27 = arith.addf %25, %26 : vector<64x7xf32>
    %28 = vector.extract_strided_slice %27 {offsets = [0, 0], sizes = [32, 7], strides = [1, 1]} : vector<64x7xf32> to vector<32x7xf32>
    %29 = vector.extract_strided_slice %27 {offsets = [32, 0], sizes = [32, 7], strides = [1, 1]} : vector<64x7xf32> to vector<32x7xf32>
    %cst_15 = arith.constant 0.000000e+00 : f32
    %30 = vector.broadcast %cst_15 : f32 to vector<32x7xf32>
    %31 = arith.cmpf ogt, %28, %30 : vector<32x7xf32>
    %cst_16 = arith.constant 1.000000e-30 : f32
    %32 = vector.broadcast %cst_16 : f32 to vector<32x7xf32>
    %33 = arith.maximumf %28, %32 : vector<32x7xf32>
    %34 = math.log %33 : vector<32x7xf32>
    %35 = arith.subf %9, %34 : vector<32x7xf32>
    %cst_17 = arith.constant 0.000000e+00 : f32
    %36 = vector.broadcast %cst_17 : f32 to vector<32x7xf32>
    %37 = arith.select %31, %35, %36 : vector<32x7xi1>, vector<32x7xf32>
    %cst_18 = arith.constant 0.000000e+00 : f32
    %38 = vector.broadcast %cst_18 : f32 to vector<32x7xf32>
    %39 = arith.cmpf ogt, %29, %38 : vector<32x7xf32>
    %40 = vector.broadcast %2 : vector<1x7xf32> to vector<32x7xf32>
    %41 = arith.addf %9, %40 : vector<32x7xf32>
    %cst_19 = arith.constant 1.000000e-30 : f32
    %42 = vector.broadcast %cst_19 : f32 to vector<32x7xf32>
    %43 = arith.maximumf %29, %42 : vector<32x7xf32>
    %44 = math.log %43 : vector<32x7xf32>
    %45 = arith.subf %41, %44 : vector<32x7xf32>
    %cst_20 = arith.constant 0.000000e+00 : f32
    %46 = vector.broadcast %cst_20 : f32 to vector<32x7xf32>
    %47 = arith.select %39, %45, %46 : vector<32x7xi1>, vector<32x7xf32>
    %48 = arith.mulf %1, %47 : vector<32x7xf32>
    %cst_21 = arith.constant dense<0.000000e+00> : vector<32xf32>
    %49 = vector.multi_reduction <add>, %48, %cst_21 [1] : vector<32x7xf32> to vector<32xf32>
    %50 = vector.shape_cast %49 : vector<32xf32> to vector<32x1xf32>
    %cst_22 = arith.constant 0.000000e+00 : f32
    %51 = vector.broadcast %cst_22 : f32 to vector<32x1xf32>
    %52 = arith.subf %51, %50 : vector<32x1xf32>
    %53 = tpu.iota {dimensions = array<i32: 0>} : vector<32x1xi32>
    %c32_i32 = arith.constant 32 : i32
    %54 = arith.muli %arg0, %c32_i32 : i32
    %55 = vector.broadcast %54 : i32 to vector<32x1xi32>
    %56 = arith.addi %53, %55 : vector<32x1xi32>
    %c64_i32 = arith.constant 64 : i32
    %57 = vector.broadcast %c64_i32 : i32 to vector<32x1xi32>
    %58 = arith.cmpi slt, %56, %57 : vector<32x1xi32>
    %cst_23 = arith.constant 0.000000e+00 : f32
    %59 = vector.broadcast %cst_23 : f32 to vector<32x1xf32>
    %60 = arith.select %58, %52, %59 : vector<32x1xi1>, vector<32x1xf32>
    %61 = vector.shape_cast %60 : vector<32x1xf32> to vector<1x32x1xf32>
    %cst_24 = arith.constant dense<0.000000e+00> : vector<1xf32>
    %62 = vector.multi_reduction <add>, %61, %cst_24 [1, 2] : vector<1x32x1xf32> to vector<1xf32>
    %63 = vector.shape_cast %62 : vector<1xf32> to vector<1x1x1xf32>
    %64 = vector.extract %63[0, 0, 0] : f32 from vector<1x1x1xf32>
    %65 = vector.broadcast %64 : f32 to vector<1x8x128xf32>
    %c0_25 = arith.constant 0 : index
    %c0_26 = arith.constant 0 : index
    %c0_27 = arith.constant 0 : index
    %66 = vector.load %arg8[%c0_25, %c0_26, %c0_27] : memref<1x8x128xf32, #tpu.memory_space<vmem>>, vector<1x8x128xf32>
    tpu.vector_store %arg8[%c0_25, %c0_26, %c0_27], %65 {strides = array<i32>} : memref<1x8x128xf32, #tpu.memory_space<vmem>>, vector<1x8x128xf32>,
    %c0_28 = arith.constant 0 : index
    %c0_29 = arith.constant 0 : index
    %67 = vector.load %arg7[%c0_28, %c0_29] : memref<7x7xbf16, #tpu.memory_space<vmem>>, vector<7x7xbf16>
    %68 = arith.truncf %37 : vector<32x7xf32> to vector<32x7xbf16>
    %69 = arith.extf %68 : vector<32x7xbf16> to vector<32x7xf32>
    %70 = arith.subf %37, %69 : vector<32x7xf32>
    %71 = arith.truncf %70 : vector<32x7xf32> to vector<32x7xbf16>
    %cst_30 = arith.constant dense<0.000000e+00> : vector<32x7xf32>
    %72 = tpu.matmul %68, %67, %cst_30 {dimension_numbers = #tpu.dot_dimension_numbers<[1], [0], [0], [1], [0, 0, 1, 1], [], []>} : vector<32x7xbf16>, vector<7x7xbf16>, vector<32x7xf32> -> vector<32x7xf32>
    %cst_31 = arith.constant dense<0.000000e+00> : vector<32x7xf32>
    %73 = tpu.matmul %71, %67, %cst_31 {dimension_numbers = #tpu.dot_dimension_numbers<[1], [0], [0], [1], [0, 0, 1, 1], [], []>} : vector<32x7xbf16>, vector<7x7xbf16>, vector<32x7xf32> -> vector<32x7xf32>
    %74 = arith.addf %72, %73 : vector<32x7xf32>
    %75 = math.exp %74 : vector<32x7xf32>
    %c0_32 = arith.constant 0 : index
    %c0_33 = arith.constant 0 : index
    %76 = vector.load %arg9[%c0_32, %c0_33] : memref<32x7xf32, #tpu.memory_space<vmem>>, vector<32x7xf32>
    tpu.vector_store %arg9[%c0_32, %c0_33], %75 {strides = array<i32>} : memref<32x7xf32, #tpu.memory_space<vmem>>, vector<32x7xf32>,
    return
  }
  func.func @transform_0(%arg0: i32) -> (i32, i32) {
    %c0_i32 = arith.constant 0 : i32
    %c0_i32_0 = arith.constant 0 : i32
    return %arg0, %c0_i32 : i32, i32
  }
  func.func @transform_1(%arg0: i32) -> (i32, i32) {
    %c0_i32 = arith.constant 0 : i32
    %c0_i32_0 = arith.constant 0 : i32
    return %arg0, %c0_i32 : i32, i32
  }
  func.func @transform_2(%arg0: i32) -> (i32, i32) {
    %c0_i32 = arith.constant 0 : i32
    %c0_i32_0 = arith.constant 0 : i32
    %c0_i32_1 = arith.constant 0 : i32
    return %c0_i32, %c0_i32_0 : i32, i32
  }
  func.func @transform_3(%arg0: i32) -> (i32, i32) {
    %c0_i32 = arith.constant 0 : i32
    %c0_i32_0 = arith.constant 0 : i32
    %c0_i32_1 = arith.constant 0 : i32
    return %c0_i32, %c0_i32_0 : i32, i32
  }
  func.func @transform_4(%arg0: i32) -> (i32, i32) {
    %c0_i32 = arith.constant 0 : i32
    %c0_i32_0 = arith.constant 0 : i32
    %c0_i32_1 = arith.constant 0 : i32
    return %c0_i32, %c0_i32_0 : i32, i32
  }
  func.func @transform_5(%arg0: i32) -> (i32, i32) {
    %c0_i32 = arith.constant 0 : i32
    %c0_i32_0 = arith.constant 0 : i32
    %c0_i32_1 = arith.constant 0 : i32
    return %c0_i32, %c0_i32_0 : i32, i32
  }
  func.func @transform_6(%arg0: i32) -> (i32, i32) {
    %c0_i32 = arith.constant 0 : i32
    %c0_i32_0 = arith.constant 0 : i32
    %c0_i32_1 = arith.constant 0 : i32
    return %c0_i32, %c0_i32_0 : i32, i32
  }
  func.func @transform_7(%arg0: i32) -> (i32, i32, i32) {
    %c0_i32 = arith.constant 0 : i32
    %c0_i32_0 = arith.constant 0 : i32
    %c0_i32_1 = arith.constant 0 : i32
    return %arg0, %c0_i32, %c0_i32_0 : i32, i32, i32
  }
  func.func @transform_8(%arg0: i32) -> (i32, i32) {
    %c0_i32 = arith.constant 0 : i32
    %c0_i32_0 = arith.constant 0 : i32
    return %arg0, %c0_i32 : i32, i32
  }
}

</mosaic_0001>

<bundles_post_ra>
// kernel: tpu_custom_call.1
= control target key start
LH: loop header
LB: loop body
LE: loop exit
PB: predicated region body
PF: predicated region fallthrough
CT: control target
= control target key end

     0   :  { %s1786_s0 = inlined_call_operand.vmem [shape: f32[64,7], index: 0, kind: input, shape index: {}]   ;;  %s1787_s1 = inlined_call_operand.vmem [shape: f32[64,7], index: 1, kind: input, shape index: {}]   ;;  %s1788_s2 = inlined_call_operand.vmem [shape: f32[1,7], index: 2, kind: input, shape index: {}]   ;;  %s1789_s3 = inlined_call_operand.vmem [shape: f32[1,7], index: 3, kind: input, shape index: {}]   ;;  %s1790_s4 = inlined_call_operand.vmem [shape: bf16[7,256], index: 4, kind: input, shape index: {}]   ;;  %s1791_s5 = inlined_call_operand.vmem [shape: bf16[256,7], index: 5, kind: input, shape index: {}]   ;;  %s1792_s6 = inlined_call_operand.vmem [shape: bf16[7,7], index: 6, kind: input, shape index: {}]   ;;  %s1793_s7 = inlined_call_operand.hbm [shape: f32[2,8,128], index: 7, kind: output, shape index: {0}]   ;;  %s1794_s8 = inlined_call_operand.vmem [shape: f32[64,7], index: 8, kind: output, shape index: {1}]  }
   0x1   :  { %1795 = sst [smem:[#allocation5_spill]] %s1786_s0 }
   0x2   :  { %14 = vsyncpa [#allocation3], 0 }
   0x3   :  { %16 = vsyncpa [#allocation3 + $0x1], 0  ;;  %s1549_s27 = smov 0   ;;  %s1551_s28 = smov 0  }
   0x4   :  { %s1553_s29 = smov 0   ;;  %s1555_s30 = smov 0  }
   0x5 LB: > { %s1570_s9 = sadd.s32 4294967295, %s1501_s30   ;;  %s1245_s10 = sadd.s32 4294967294, %s1501_s30   ;;  %s1501_s30 = sphi %s1555_s30, %s1802_s30   ;;  %s1497_s29 = sphi %s1553_s29, %s1801_s29   ;;  %s1493_s28 = sphi %s1551_s28, %s1800_s28   ;;  %s1489_s27 = sphi %s1549_s27, %s1799_s27  }
   0x6   : > { %s1574_s11 = sadd.s32 1, %s1501_s30   ;;  %s186_s12 = sadd.s32 1, %s1497_s29 }
   0x7   : > { %s183_s13 = ssub.s32 %s1501_s30, %s1574_s11  ;;  %p196_p0 = scmp.ne.s32.totalorder %s1497_s29, %s1493_s28 }
   0x8   : > { %p184_p1 = scmp.eq.s32.totalorder %s183_s13, 0  ;;  %p197_p2 = scmp.eq.s32.totalorder %s1570_s9, 1 }
   0x9   : > { %p202_p3 = scmp.ne.s32.totalorder %s1493_s28, %s1489_s27  ;;  %p203_p4 = scmp.eq.s32.totalorder %s1245_s10, 1 }
   0xa   : > { %s1585_s14 = scalar_select %p184_p1, %s1497_s29, %s186_s12  }
   0xb   : > { %p1587_p5 = por %p197_p2, %p196_p0  ;;  %p1591_p6 = por %p203_p4, %p202_p3 }
   0xc   : > { %p1248_p7 = scmp.ge.s32.totalorder %s1501_s30, 1  ;;  %p280_p8 = scmp.lt.s32.totalorder %s1501_s30, 3 }
   0xe   : > { %p281_p9 = pnand %p1248_p7, %p280_p8 }
   0xf   : > { %s1250_s17 = sshll.u32 (!%p281_p9), %s1570_s9, 2  ;;  %s1798_s0 = sld [smem:[#allocation5_spill]] (!%p281_p9) }
  0x10   : > { %284 = sbr.rel (%p281_p9) target bundleno = 848 (0x350), region = 48  ;;  %p325_p10 = scmp.lt.s32.totalorder (!%p281_p9), %s1250_s17, 7 }
  0x11   : > { %s1336_s20 = sshll.u32 (!%p281_p9), %s1570_s9, 5  ;;  %s1342_s22 = sshll.u32 (!%p281_p9), %s1570_s9, 3 }
  0x12   : > { %s1140_s25 = scalar_lea.hbm (!%p281_p9), %s1793_s7, %s1342_s22  ;;  %s1459_s22 = scalar_lea.hbm (!%p281_p9), %s1793_s7, 16 }
  0x15   : > { %s1804_s17 = smov (!%p325_p10, %s1250_s17), 7  ;;  %vm386_vm0 = vcmask 56320   ;;  %v353_v8 = vld [vmem:[%s1790_s4] sm:$0xff]  ;;  %vm463_vm1 = vcmask 1042432   ;;  %vm464_vm2 = vcmask 1043456   ;;  %v1503_v10 = vmov 65535  }
  0x16   : > { %s1598_s18 = sshll.u32 %s1804_s17, 3  ;;  %v447_v9 = vunpack.c.l.b16 %v353_v8  ;;  %v465_v11 = vsel %vm463_vm1, 4294967295, %v1503_v10  ;;  %v448_v12 = vunpack.c.h.b16 %v353_v8  ;;  %v1406_v28 = vld [vmem:[%s1789_s3] ss:$0 sm:$0xff]  ;;  %vm1015_vm14 = vcmask 7168  }
  0x17   : > { %s328_s21 = scalar_lea.vmem %s1798_s0, %s1598_s18  ;;  %v1611_v13 = vsel %vm464_vm2, %v465_v11, 0  ;;  %s1723_s12 = scalar_lea.vmem %s1787_s1, %s1598_s18 }
  0x18   : > { %v345_v0 = vld [vmem:[%s328_s21 + $0x10] sm:$0xff]  ;;  %v343_v1 = vld [vmem:[%s328_s21] sm:$0xff]  ;;  %v346_v4 = vld [vmem:[%s328_s21 + $0x18] sm:$0xff]  ;;  %v449_v14 = vpack.c.b16 %v447_v9, %v447_v9  ;;  %v450_v15 = vpack.c.b16 %v448_v12, %v448_v12  ;;  %s1743_s19 = scalar_lea.vmem %s1794_s8, %s1598_s18  ;;  %s314_s18 = sand.u32 1, %s1493_s28  }
  0x19   : > { %v393_v2 = vsel %vm386_vm0, %v345_v0, -inf  ;;  %v387_v3 = vsel %vm386_vm0, %v343_v1, -inf  ;;  %v344_v5 = vld [vmem:[%s328_s21 + $0x8] sm:$0xff]  ;;  %v396_v6 = vsel %vm386_vm0, %v346_v4, -inf  ;;  %v1352_v12 = vld [vmem:[%s1791_s5 + $0x38] sm:$0xff]  ;;  %s1249_s21 = sshll.u32 %s314_s18, 3 }
  0x1a   : > { %394 = vmax.xlane.f32.xlu0 %v393_v2  ;;  %388 = vmax.xlane.f32.xlu1 %v387_v3  ;;  %v390_v7 = vsel %vm386_vm0, %v344_v5, -inf  ;;  %v468_v16 = vand.u32 %v1611_v13, %v449_v14  ;;  %v471_v17 = vand.u32 %v1611_v13, %v450_v15  ;;  %v1360_v14 = vld [vmem:[%s1791_s5 + $0x78] sm:$0xff]  ;;  %v1351_v15 = vld [vmem:[%s1791_s5 + $0x30] sm:$0xff]  ;;  %s316_s26 = scalar_lea.vmem [#allocation2], %s1249_s21  ;;  %s1125_s17 = scalar_lea.sflag [#allocation3], %s314_s18 }
  0x1b   : > { %s1142_s10 = sshll.u32 %s316_s26, 4  ;;  %s1143_s10 = int_to_ptr.vmem [resolvable:$true] %s1142_s10 }
  0x1c   : > { %480 = vmatpush.bf16.msra.mxu0 %v468_v16  ;;  %509 = vmatpush.bf16.msra.mxu1 %v471_v17 }
  0x1d   : > { %1361 = vmatpush.bf16.msra.mxu2 %v468_v16  ;;  %1362 = vmatpush.bf16.msra.mxu3 %v471_v17 }
  0x20   : > { %765 = vmatpush.bf16.msrb.mxu0 %v1352_v12  ;;  %794 = vmatpush.bf16.msrb.mxu1 %v1360_v14 }
  0x21   : > { %570 = vmatpush.bf16.msrb.mxu2 %v468_v16  ;;  %599 = vmatpush.bf16.msrb.mxu3 %v471_v17  ;;  %v1359_v16 = vld [vmem:[%s1791_s5 + $0x70] sm:$0xff]  ;;  %v1350_v17 = vld [vmem:[%s1791_s5 + $0x28] sm:$0xff] }
  0x22   : > { %397 = vmax.xlane.f32.xlu0 %v396_v6  ;;  %391 = vmax.xlane.f32.xlu1 %v390_v7 }
  0x24   : > { %766 = vmatpush.bf16.msrb.mxu0 %v1351_v15  ;;  %795 = vmatpush.bf16.msrb.mxu1 %v1359_v16 }
  0x28   : > { %767 = vmatpush.bf16.msrb.mxu0 %v1350_v17 }
  0x8d   : > { %v395_v18 = vpop.xlane.xlu0 %394  ;;  %v389_v19 = vpop.xlane.xlu1 %388 }
  0x8e   : > { %v1615_v20 = vsub.f32 %v345_v0, %v395_v18  ;;  %v1617_v21 = vsub.f32 %v343_v1, %v389_v19  ;;  %v1358_v18 = vld [vmem:[%s1791_s5 + $0x68] sm:$0xff] }
  0x8f   : > { %796 = vmatpush.bf16.msrb.mxu1 %v1358_v18 }
  0x90   : > { %v407_v22 = vmul.f32 1.442695, %v1615_v20  ;;  %v403_v23 = vmul.f32 1.442695, %v1617_v21 }
  0x92   : > { %1407 = vpow2.f32 %v407_v22 }
  0x93   : > { %1409 = vpow2.f32 %v403_v23 }
  0x95   : > { %v398_v24 = vpop.xlane.xlu0 %397  ;;  %v392_v25 = vpop.xlane.xlu1 %391 }
  0x96   : > { %v1621_v26 = vsub.f32 %v346_v4, %v398_v24  ;;  %v1623_v27 = vsub.f32 %v344_v5, %v392_v25  ;;  %v1349_v24 = vld [vmem:[%s1791_s5 + $0x20] sm:$0xff] }
  0x97   : > { %v1357_v25 = vld [vmem:[%s1791_s5 + $0x60] sm:$0xff]  ;;  %768 = vmatpush.bf16.msrb.mxu0 %v1349_v24 }
  0x98   : > { %v1408_v29 = vpop.eup %1407  ;;  %v409_v30 = vmul.f32 1.442695, %v1621_v26  ;;  %v405_v31 = vmul.f32 1.442695, %v1623_v27  ;;  %797 = vmatpush.bf16.msrb.mxu1 %v1357_v25 }
  0x99   : > { %v1410_v32 = vpop.eup %1409  ;;  %v416_v33 = vmul.f32 %v1408_v29, %v1406_v28  ;;  %v420_v55 = vpack.c.bf16 %v1408_v29, %v1408_v29 }
  0x9a   : > { %1411 = vpow2.f32 %v409_v30  ;;  %v418_v34 = vpack.c.bf16 %v1410_v32, %v1410_v32  ;;  %v414_v63 = vmul.f32 %v1410_v32, %v1406_v28  ;;  %v1347_v30 = vld [vmem:[%s1791_s5 + $0x10] sm:$0xff] }
  0x9b   : > { %1413 = vpow2.f32 %v405_v31  ;;  %v424_v35 = vpack.c.bf16 %v416_v33, %v416_v33  ;;  %v428_v57 = vunpack.c.l.bf16 %v420_v55  ;;  %v541_v9 = vunpack.c.l.b16 %v420_v55  ;;  %v1355_v31 = vld [vmem:[%s1791_s5 + $0x50] sm:$0xff] }
  0x9c   : > { %v426_v37 = vunpack.c.l.bf16 %v418_v34  ;;  %v539_v59 = vunpack.c.l.b16 %v418_v34  ;;  %v422_v2 = vpack.c.bf16 %v414_v63, %v414_v63  ;;  %v1345_v34 = vld [vmem:[%s1791_s5] sm:$0xff] }
  0x9d   : > { %v432_v42 = vunpack.c.l.bf16 %v424_v35  ;;  %v545_v46 = vunpack.c.l.b16 %v424_v35  ;;  %v436_v61 = vsub.f32 %v1408_v29, %v428_v57  ;;  %v1356_v29 = vld [vmem:[%s1791_s5 + $0x58] sm:$0xff]  ;;  %v1353_v35 = vld [vmem:[%s1791_s5 + $0x40] sm:$0xff] }
  0x9e   : > { %v434_v44 = vsub.f32 %v1410_v32, %v426_v37  ;;  %v430_v4 = vunpack.c.l.bf16 %v422_v2  ;;  %v543_v19 = vunpack.c.l.b16 %v422_v2  ;;  %798 = vmatpush.bf16.msrb.mxu1 %v1356_v29  ;;  %v1346_v32 = vld [vmem:[%s1791_s5 + $0x8] sm:$0xff] }
  0x9f   : > { %v440_v49 = vsub.f32 %v416_v33, %v432_v42  ;;  %v1354_v33 = vld [vmem:[%s1791_s5 + $0x48] sm:$0xff] }
  0xa0   : > { %v1412_v36 = vpop.eup %1411  ;;  %v438_v6 = vsub.f32 %v414_v63, %v430_v4 }
  0xa1   : > { %v1414_v38 = vpop.eup %1413  ;;  %v417_v39 = vmul.f32 %v1412_v36, %v1406_v28  ;;  %v421_v54 = vpack.c.bf16 %v1412_v36, %v1412_v36 }
  0xa2   : > { %v419_v40 = vpack.c.bf16 %v1414_v38, %v1414_v38  ;;  %v415_v0 = vmul.f32 %v1414_v38, %v1406_v28  ;;  %v1348_v28 = vld [vmem:[%s1791_s5 + $0x18] sm:$0xff]  ;;  %799 = vmatpush.bf16.msrb.mxu1 %v1355_v31 }
  0xa3   : > { %v425_v41 = vpack.c.bf16 %v417_v39, %v417_v39  ;;  %v429_v56 = vunpack.c.l.bf16 %v421_v54  ;;  %v542_v8 = vunpack.c.l.b16 %v421_v54  ;;  %769 = vmatpush.bf16.msrb.mxu0 %v1348_v28 }
  0xa4   : > { %v427_v43 = vunpack.c.l.bf16 %v419_v40  ;;  %v540_v60 = vunpack.c.l.b16 %v419_v40  ;;  %v423_v3 = vpack.c.bf16 %v415_v0, %v415_v0 }
  0xa5   : > { %v433_v45 = vunpack.c.l.bf16 %v425_v41  ;;  %v546_v47 = vunpack.c.l.b16 %v425_v41  ;;  %v437_v58 = vsub.f32 %v1412_v36, %v429_v56  ;;  %v548_v11 = vpack.c.b16 %v542_v8, %v541_v9 }
  0xa6   : > { %v435_v48 = vsub.f32 %v1414_v38, %v427_v43  ;;  %v547_v1 = vpack.c.b16 %v540_v60, %v539_v59  ;;  %v431_v5 = vunpack.c.l.bf16 %v423_v3  ;;  %v544_v22 = vunpack.c.l.b16 %v423_v3  ;;  %800 = vmatpush.bf16.msrb.mxu1 %v1354_v33 }
  0xa7   : > { %v441_v50 = vsub.f32 %v417_v39, %v433_v45  ;;  %v550_v51 = vpack.c.b16 %v546_v47, %v545_v46  ;;  %v443_v62 = vpack.c.bf16 %v437_v58, %v436_v61  ;;  %770 = vmatpush.bf16.msrb.mxu0 %v1347_v30 }
  0xa8   : > { %v442_v52 = vpack.c.bf16 %v435_v48, %v434_v44  ;;  %v439_v7 = vsub.f32 %v415_v0, %v431_v5  ;;  %v549_v23 = vpack.c.b16 %v544_v22, %v543_v19 }
  0xa9   : > { %v445_v53 = vpack.c.bf16 %v441_v50, %v440_v49 }
  0xaa   : > { %1256 = vmatmul.msk.bf16.vlgmr.msra.gmra.mxu0 %vm386_vm0, %v442_v52  ;;  %1260 = vmatmul.msk.bf16.vlgmr.msra.gmra.mxu1 %vm386_vm0, %v442_v52  ;;  %v444_v10 = vpack.c.bf16 %v439_v7, %v438_v6 }
  0xab   : > { %1259 = vmatmul.msk.bf16.vlgmr.msra.gmra.mxu2 %vm386_vm0, %v445_v53  ;;  %1263 = vmatmul.msk.bf16.vlgmr.msra.gmra.mxu3 %vm386_vm0, %v445_v53 }
  0xac   : > { %863 = vmatpush.bf16.msra.mxu2 %v1352_v12  ;;  %892 = vmatpush.bf16.msra.mxu3 %v1360_v14 }
  0xad   : > { %771 = vmatpush.bf16.msrb.mxu0 %v1346_v32  ;;  %801 = vmatpush.bf16.msrb.mxu1 %v1353_v35 }
  0xb0   : > { %864 = vmatpush.bf16.msra.mxu2 %v1351_v15  ;;  %893 = vmatpush.bf16.msra.mxu3 %v1359_v16 }
  0xb1   : > { %772 = vmatpush.bf16.msrb.mxu0 %v1345_v34 }
  0xb4   : > { %865 = vmatpush.bf16.msra.mxu2 %v1350_v17  ;;  %894 = vmatpush.bf16.msra.mxu3 %v1358_v18 }
  0xb8   : > { %866 = vmatpush.bf16.msra.mxu2 %v1349_v24  ;;  %895 = vmatpush.bf16.msra.mxu3 %v1357_v25 }
  0xba   : > { %1257 = vmatmul.msk.bf16.gmra.mxu0 %vm386_vm0, %v443_v62  ;;  %1261 = vmatmul.msk.bf16.gmra.mxu1 %vm386_vm0, %v443_v62 }
  0xbb   : > { %1264 = vmatmul.msk.bf16.vlgmr.msrb.gmra.mxu2 %vm386_vm0, %v547_v1  ;;  %1268 = vmatmul.msk.bf16.vlgmr.msrb.gmra.mxu3 %vm386_vm0, %v547_v1 }
  0xbc   : > { %867 = vmatpush.bf16.msra.mxu2 %v1348_v28  ;;  %896 = vmatpush.bf16.msra.mxu3 %v1356_v29 }
  0xc0   : > { %868 = vmatpush.bf16.msra.mxu2 %v1347_v30  ;;  %897 = vmatpush.bf16.msra.mxu3 %v1355_v31 }
  0xc4   : > { %869 = vmatpush.bf16.msra.mxu2 %v1346_v32  ;;  %898 = vmatpush.bf16.msra.mxu3 %v1354_v33 }
  0xc8   : > { %870 = vmatpush.bf16.msra.mxu2 %v1345_v34  ;;  %899 = vmatpush.bf16.msra.mxu3 %v1353_v35 }
  0xca   : > { %1258 = vmatmul.msk.bf16.gmra.mxu0 %vm386_vm0, %v444_v10  ;;  %1262 = vmatmul.msk.bf16.gmra.mxu1 %vm386_vm0, %v444_v10 }
  0xcb   : > { %1265 = vmatmul.msk.bf16.gmra.mxu2 %vm386_vm0, %v548_v11  ;;  %1269 = vmatmul.msk.bf16.gmra.mxu3 %vm386_vm0, %v548_v11 }
  0xdb   : > { %1266 = vmatmul.msk.bf16.gmra.mxu2 %vm386_vm0, %v549_v23  ;;  %1270 = vmatmul.msk.bf16.gmra.mxu3 %vm386_vm0, %v549_v23 }
  0xeb   : > { %1267 = vmatmul.msk.bf16.gmra.mxu2 %vm386_vm0, %v550_v51  ;;  %1271 = vmatmul.msk.bf16.gmra.mxu3 %vm386_vm0, %v550_v51 }
 0x127   : > { %v482_v38 = vpop.f32.mrf.mxu0  ;;  %v511_v39 = vpop.f32.mrf.mxu1 }
 0x12e   : > { %v1694_v36 = vpop.f32.mrf.mxu2  ;;  %v1696_v37 = vpop.f32.mrf.mxu3 }
 0x12f   : > { %v484_v42 = vpop.f32.mrf.mxu0  ;;  %v513_v43 = vpop.f32.mrf.mxu1 }
 0x136   : > { %v1698_v40 = vpop.f32.mrf.mxu2  ;;  %v1700_v41 = vpop.f32.mrf.mxu3 }
 0x137   : > { %v487_v51 = vpop.f32.mrf.mxu0  ;;  %v516_v52 = vpop.f32.mrf.mxu1 }
 0x13e   : > { %v572_v44 = vpop.f32.mrf.mxu2  ;;  %v601_v45 = vpop.f32.mrf.mxu3 }
 0x13f   : > { %v573_v46 = vadd.f32 %v572_v44, %v482_v38  ;;  %v602_v47 = vadd.f32 %v601_v45, %v511_v39  ;;  %v489_v12 = vpop.f32.mrf.mxu0  ;;  %v518_v14 = vpop.f32.mrf.mxu1 }
 0x141   : > { %v621_v48 = vpack.c.bf16 %v602_v47, %v573_v46 }
 0x143   : > { %v629_v55 = vunpack.c.l.bf16 %v621_v48  ;;  %v630_v57 = vunpack.c.h.bf16 %v621_v48  ;;  %v831_v58 = vunpack.c.l.b16 %v621_v48  ;;  %v832_v59 = vunpack.c.h.b16 %v621_v48 }
 0x145   : > { %v645_v0 = vsub.f32 %v573_v46, %v629_v55  ;;  %v646_v5 = vsub.f32 %v602_v47, %v630_v57 }
 0x146   : > { %v574_v49 = vpop.f32.mrf.mxu2  ;;  %v603_v50 = vpop.f32.mrf.mxu3 }
 0x147   : > { %v575_v53 = vadd.f32 %v574_v49, %v484_v42  ;;  %v604_v54 = vadd.f32 %v603_v50, %v513_v43  ;;  %v492_v29 = vpop.f32.mrf.mxu0  ;;  %v521_v30 = vpop.f32.mrf.mxu1 }
 0x149   : > { %v622_v56 = vpack.c.bf16 %v604_v54, %v575_v53 }
 0x14b   : > { %v632_v60 = vunpack.c.h.bf16 %v622_v56  ;;  %v833_v61 = vunpack.c.l.b16 %v622_v56  ;;  %v834_v62 = vunpack.c.h.b16 %v622_v56  ;;  %v631_v63 = vunpack.c.l.bf16 %v622_v56 }
 0x14d   : > { %v648_v1 = vsub.f32 %v604_v54, %v632_v60  ;;  %v847_v2 = vpack.c.b16 %v833_v61, %v831_v58  ;;  %v848_v3 = vpack.c.b16 %v834_v62, %v832_v59  ;;  %v647_v4 = vsub.f32 %v575_v53, %v631_v63 }
 0x14e   : > { %v577_v6 = vpop.f32.mrf.mxu2  ;;  %v606_v7 = vpop.f32.mrf.mxu3 }
 0x14f   : > { %871 = vmatmul.bf16.vlgmr.msra.gmra.mxu2 %v847_v2  ;;  %900 = vmatmul.bf16.vlgmr.msra.gmra.mxu3 %v848_v3  ;;  %v661_v8 = vpack.c.bf16 %v647_v4, %v645_v0  ;;  %v578_v9 = vadd.f32 %v577_v6, %v487_v51  ;;  %v607_v10 = vadd.f32 %v606_v7, %v516_v52  ;;  %v494_v52 = vpop.f32.mrf.mxu0  ;;  %v523_v53 = vpop.f32.mrf.mxu1 }
 0x150   : > { %v662_v11 = vpack.c.bf16 %v648_v1, %v646_v5 }
 0x151   : > { %773 = vmatmul.bf16.vlgmr.msrb.gmra.mxu0 %v661_v8  ;;  %v623_v15 = vpack.c.bf16 %v607_v10, %v578_v9 }
 0x152   : > { %802 = vmatmul.bf16.vlgmr.msrb.gmra.mxu1 %v662_v11 }
 0x153   : > { %v633_v22 = vunpack.c.l.bf16 %v623_v15  ;;  %v634_v24 = vunpack.c.h.bf16 %v623_v15  ;;  %v835_v25 = vunpack.c.l.b16 %v623_v15  ;;  %v836_v28 = vunpack.c.h.b16 %v623_v15 }
 0x155   : > { %v649_v35 = vsub.f32 %v578_v9, %v633_v22  ;;  %v650_v44 = vsub.f32 %v607_v10, %v634_v24 }
 0x156   : > { %v579_v16 = vpop.f32.mrf.mxu2  ;;  %v608_v17 = vpop.f32.mrf.mxu3 }
 0x157   : > { %v580_v18 = vadd.f32 %v579_v16, %v489_v12  ;;  %v609_v19 = vadd.f32 %v608_v17, %v518_v14 }
 0x159   : > { %v624_v23 = vpack.c.bf16 %v609_v19, %v580_v18 }
 0x15b   : > { %v636_v31 = vunpack.c.h.bf16 %v624_v23  ;;  %v837_v32 = vunpack.c.l.b16 %v624_v23  ;;  %v838_v33 = vunpack.c.h.b16 %v624_v23  ;;  %v635_v34 = vunpack.c.l.bf16 %v624_v23 }
 0x15d   : > { %v652_v38 = vsub.f32 %v609_v19, %v636_v31  ;;  %v849_v39 = vpack.c.b16 %v837_v32, %v835_v25  ;;  %v850_v42 = vpack.c.b16 %v838_v33, %v836_v28  ;;  %v651_v43 = vsub.f32 %v580_v18, %v635_v34 }
 0x15e   : > { %v582_v45 = vpop.f32.mrf.mxu2  ;;  %v611_v46 = vpop.f32.mrf.mxu3 }
 0x15f   : > { %876 = vmatmul.bf16.gmra.mxu2 %v849_v39  ;;  %905 = vmatmul.bf16.gmra.mxu3 %v850_v42  ;;  %v663_v47 = vpack.c.bf16 %v651_v43, %v649_v35  ;;  %v583_v48 = vadd.f32 %v582_v45, %v492_v29  ;;  %v612_v49 = vadd.f32 %v611_v46, %v521_v30 }
 0x160   : > { %v664_v50 = vpack.c.bf16 %v652_v38, %v650_v44 }
 0x161   : > { %778 = vmatmul.bf16.gmra.mxu0 %v663_v47  ;;  %v625_v51 = vpack.c.bf16 %v612_v49, %v583_v48 }
 0x162   : > { %807 = vmatmul.bf16.gmra.mxu1 %v664_v50 }
 0x163   : > { %v637_v58 = vunpack.c.l.bf16 %v625_v51  ;;  %v638_v60 = vunpack.c.h.bf16 %v625_v51  ;;  %v839_v61 = vunpack.c.l.b16 %v625_v51  ;;  %v840_v62 = vunpack.c.h.b16 %v625_v51 }
 0x165   : > { %v653_v3 = vsub.f32 %v583_v48, %v637_v58  ;;  %v654_v8 = vsub.f32 %v612_v49, %v638_v60 }
 0x166   : > { %v584_v54 = vpop.f32.mrf.mxu2  ;;  %v613_v55 = vpop.f32.mrf.mxu3 }
 0x167   : > { %v585_v56 = vadd.f32 %v584_v54, %v494_v52  ;;  %v614_v57 = vadd.f32 %v613_v55, %v523_v53 }
 0x169   : > { %v626_v59 = vpack.c.bf16 %v614_v57, %v585_v56 }
 0x16b   : > { %v640_v63 = vunpack.c.h.bf16 %v626_v59  ;;  %v841_v0 = vunpack.c.l.b16 %v626_v59  ;;  %v842_v1 = vunpack.c.h.b16 %v626_v59  ;;  %v639_v2 = vunpack.c.l.bf16 %v626_v59 }
 0x16d   : > { %v656_v4 = vsub.f32 %v614_v57, %v640_v63  ;;  %v851_v5 = vpack.c.b16 %v841_v0, %v839_v61  ;;  %v852_v6 = vpack.c.b16 %v842_v1, %v840_v62  ;;  %v655_v7 = vsub.f32 %v585_v56, %v639_v2 }
 0x16e   : > { %v587_v9 = vpop.f32.mrf.mxu2  ;;  %v616_v10 = vpop.f32.mrf.mxu3 }
 0x16f   : > { %v588_v11 = vadd.f32 %v587_v9, %v1694_v36  ;;  %v617_v12 = vadd.f32 %v616_v10, %v1696_v37  ;;  %881 = vmatmul.bf16.gmra.mxu2 %v851_v5  ;;  %910 = vmatmul.bf16.gmra.mxu3 %v852_v6  ;;  %v665_v14 = vpack.c.bf16 %v655_v7, %v653_v3 }
 0x170   : > { %v666_v15 = vpack.c.bf16 %v656_v4, %v654_v8 }
 0x171   : > { %v627_v16 = vpack.c.bf16 %v617_v12, %v588_v11  ;;  %783 = vmatmul.bf16.gmra.mxu0 %v665_v14 }
 0x172   : > { %812 = vmatmul.bf16.gmra.mxu1 %v666_v15 }
 0x173   : > { %v642_v17 = vunpack.c.h.bf16 %v627_v16  ;;  %v641_v18 = vunpack.c.l.bf16 %v627_v16  ;;  %v843_v29 = vunpack.c.l.b16 %v627_v16  ;;  %v844_v37 = vunpack.c.h.b16 %v627_v16 }
 0x175   : > { %v658_v19 = vsub.f32 %v617_v12, %v642_v17  ;;  %v657_v22 = vsub.f32 %v588_v11, %v641_v18 }
 0x176   : > { %v589_v23 = vpop.f32.mrf.mxu2  ;;  %v618_v24 = vpop.f32.mrf.mxu3 }
 0x177   : > { %v590_v25 = vadd.f32 %v589_v23, %v1698_v40  ;;  %v619_v28 = vadd.f32 %v618_v24, %v1700_v41  ;;  %v1034_v41 = vld [vmem:[%s1792_s6] sm:$0xf] }
 0x178   : > { %v1056_v45 = vand.u32 %v1034_v41, %v1611_v13 }
 0x179   : > { %v628_v36 = vpack.c.bf16 %v619_v28, %v590_v25 }
 0x17a   : > { %1100 = vmatpush.bf16.msra.mxu1 %v1056_v45  ;;  %1065 = vmatpush.bf16.msra.mxu0 %v1056_v45 }
 0x17b   : > { %v644_v30 = vunpack.c.h.bf16 %v628_v36  ;;  %v845_v31 = vunpack.c.l.b16 %v628_v36  ;;  %v846_v32 = vunpack.c.h.b16 %v628_v36  ;;  %v643_v33 = vunpack.c.l.bf16 %v628_v36 }
 0x17d   : > { %v660_v34 = vsub.f32 %v619_v28, %v644_v30  ;;  %v853_v35 = vpack.c.b16 %v845_v31, %v843_v29  ;;  %v854_v38 = vpack.c.b16 %v846_v32, %v844_v37  ;;  %v659_v39 = vsub.f32 %v590_v25, %v643_v33 }
 0x17f   : > { %886 = vmatmul.bf16.gmra.mxu2 %v853_v35  ;;  %915 = vmatmul.bf16.gmra.mxu3 %v854_v38  ;;  %v667_v42 = vpack.c.bf16 %v659_v39, %v657_v22  ;;  %v668_v43 = vpack.c.bf16 %v660_v34, %v658_v19 }
 0x181   : > { %788 = vmatmul.bf16.gmra.mxu0 %v667_v42 }
 0x182   : > { %817 = vmatmul.bf16.gmra.mxu1 %v668_v43 }
 0x1ce   : > { %v774_v40 = vpop.f32.mrf.mxu0 }
 0x1cf   : > { %v803_v44 = vpop.f32.mrf.mxu1 }
 0x1d0   : > { %v804_v46 = vadd.f32 %v803_v44, %v774_v40 }
 0x1d2   : > { %v872_v47 = vpop.f32.mrf.mxu2  ;;  %v901_v48 = vpop.f32.mrf.mxu3 }
 0x1d3   : > { %v873_v49 = vadd.f32 %v872_v47, %v804_v46 }
 0x1d5   : > { %v902_v50 = vadd.f32 %v901_v48, %v873_v49 }
 0x1d6   : > { %v776_v51 = vpop.f32.mrf.mxu0 }
 0x1d7   : > { %v925_v52 = vmax.f32 %v902_v50, 1e-30  ;;  %v805_v53 = vpop.f32.mrf.mxu1  ;;  %vm921_vm3 = vcmp.gt.f32.partialorder %v902_v50, 0.0 }
 0x1d8   : > { %v806_v54 = vadd.f32 %v805_v53, %v776_v51 }
 0x1d9   : > { %1415 = vlog2.f32 %v925_v52 }
 0x1da   : > { %v874_v55 = vpop.f32.mrf.mxu2  ;;  %v903_v56 = vpop.f32.mrf.mxu3 }
 0x1db   : > { %v875_v57 = vadd.f32 %v874_v55, %v806_v54 }
 0x1dd   : > { %v904_v58 = vadd.f32 %v903_v56, %v875_v57 }
 0x1de   : > { %v779_v59 = vpop.f32.mrf.mxu0 }
 0x1df   : > { %v1416_v60 = vpop.eup %1415  ;;  %v926_v61 = vmax.f32 %v904_v58, 1e-30  ;;  %v808_v13 = vpop.f32.mrf.mxu1  ;;  %vm922_vm4 = vcmp.gt.f32.partialorder %v904_v58, 0.0 }
 0x1e0   : > { %v930_v62 = vmul.f32 0.6931472, %v1416_v60  ;;  %v809_v63 = vadd.f32 %v808_v13, %v779_v59  ;;  %v1405_v60 = vld [vmem:[%s1788_s2] ss:$0 sm:$0xff] }
 0x1e1   : > { %1417 = vlog2.f32 %v926_v61 }
 0x1e2   : > { %v937_v0 = vsub.f32 %v1617_v21, %v930_v62  ;;  %v877_v1 = vpop.f32.mrf.mxu2  ;;  %v906_v2 = vpop.f32.mrf.mxu3 }
 0x1e3   : > { %v878_v3 = vadd.f32 %v877_v1, %v809_v63 }
 0x1e4   : > { %v941_v4 = vsel %vm921_vm3, %v937_v0, 0.0 }
 0x1e5   : > { %v907_v5 = vadd.f32 %v906_v2, %v878_v3  ;;  %v1035_v10 = vpack.c.bf16 %v941_v4, %v941_v4  ;;  %v952_v3 = vadd.f32 %v1405_v60, %v1617_v21 }
 0x1e6   : > { %v781_v6 = vpop.f32.mrf.mxu0 }
 0x1e7   : > { %v1418_v7 = vpop.eup %1417  ;;  %v927_v8 = vmax.f32 %v907_v5, 1e-30  ;;  %v810_v9 = vpop.f32.mrf.mxu1  ;;  %v1039_v18 = vunpack.c.l.bf16 %v1035_v10  ;;  %v1081_v28 = vunpack.c.l.b16 %v1035_v10  ;;  %vm923_vm5 = vcmp.gt.f32.partialorder %v907_v5, 0.0 }
 0x1e8   : > { %v932_v11 = vmul.f32 0.6931472, %v1418_v7  ;;  %v811_v12 = vadd.f32 %v810_v9, %v781_v6 }
 0x1e9   : > { %1419 = vlog2.f32 %v927_v8  ;;  %v1043_v31 = vsub.f32 %v941_v4, %v1039_v18 }
 0x1ea   : > { %v938_v14 = vsub.f32 %v1623_v27, %v932_v11  ;;  %v879_v15 = vpop.f32.mrf.mxu2  ;;  %v908_v16 = vpop.f32.mrf.mxu3  ;;  %v347_v11 = vld [vmem:[%s1723_s12] sm:$0xff] }
 0x1eb   : > { %v880_v17 = vadd.f32 %v879_v15, %v811_v12 }
 0x1ec   : > { %v942_v19 = vsel %vm922_vm4, %v938_v14, 0.0 }
 0x1ed   : > { %v1036_v22 = vpack.c.bf16 %v942_v19, %v942_v19  ;;  %v909_v23 = vadd.f32 %v908_v16, %v880_v17 }
 0x1ee   : > { %v784_v24 = vpop.f32.mrf.mxu0 }
 0x1ef   : > { %v1420_v25 = vpop.eup %1419  ;;  %v1040_v36 = vunpack.c.l.bf16 %v1036_v22  ;;  %v1082_v29 = vunpack.c.l.b16 %v1036_v22  ;;  %v928_v37 = vmax.f32 %v909_v23, 1e-30  ;;  %v813_v30 = vpop.f32.mrf.mxu1  ;;  %vm924_vm6 = vcmp.gt.f32.partialorder %v909_v23, 0.0 }
 0x1f0   : > { %v934_v32 = vmul.f32 0.6931472, %v1420_v25  ;;  %v814_v35 = vadd.f32 %v813_v30, %v784_v24  ;;  %v953_v25 = vadd.f32 %v1405_v60, %v1623_v27  ;;  %v954_v27 = vadd.f32 %v1405_v60, %v1615_v20 }
 0x1f1   : > { %v1044_v33 = vsub.f32 %v942_v19, %v1040_v36  ;;  %v1085_v34 = vpack.c.b16 %v1082_v29, %v1081_v28  ;;  %1421 = vlog2.f32 %v928_v37  ;;  %v348_v37 = vld [vmem:[%s1723_s12 + $0x8] sm:$0xff] }
 0x1f2   : > { %v939_v38 = vsub.f32 %v1615_v20, %v934_v32  ;;  %v882_v39 = vpop.f32.mrf.mxu2  ;;  %v911_v42 = vpop.f32.mrf.mxu3 }
 0x1f3   : > { %v1047_v43 = vpack.c.bf16 %v1044_v33, %v1043_v31  ;;  %v883_v40 = vadd.f32 %v882_v39, %v814_v35  ;;  %1339 = vmatmul.msk.bf16.vlgmr.msra.gmra.mxu1 %vm386_vm0, %v1085_v34 }
 0x1f4   : > { %v943_v41 = vsel %vm923_vm5, %v939_v38, 0.0 }
 0x1f5   : > { %v912_v44 = vadd.f32 %v911_v42, %v883_v40  ;;  %1337 = vmatmul.msk.bf16.vlgmr.msra.gmra.mxu0 %vm386_vm0, %v1047_v43  ;;  %v1037_v49 = vpack.c.bf16 %v943_v41, %v943_v41  ;;  %v349_v40 = vld [vmem:[%s1723_s12 + $0x10] sm:$0xff] }
 0x1f6   : > { %v786_v45 = vpop.f32.mrf.mxu0 }
 0x1f7   : > { %v1422_v46 = vpop.eup %1421  ;;  %v956_v47 = vmax.f32 %v912_v44, 1e-30  ;;  %v815_v48 = vpop.f32.mrf.mxu1  ;;  %v1041_v56 = vunpack.c.l.bf16 %v1037_v49  ;;  %v1083_v1 = vunpack.c.l.b16 %v1037_v49  ;;  %vm945_vm7 = vcmp.gt.f32.partialorder %v912_v44, 0.0 }
 0x1f8   : > { %v936_v50 = vmul.f32 0.6931472, %v1422_v46  ;;  %v816_v51 = vadd.f32 %v815_v48, %v786_v45  ;;  %v955_v48 = vadd.f32 %v1405_v60, %v1621_v26 }
 0x1f9   : > { %1423 = vlog2.f32 %v956_v47  ;;  %v1045_v4 = vsub.f32 %v943_v41, %v1041_v56 }
 0x1fa   : > { %v940_v52 = vsub.f32 %v1621_v26, %v936_v50  ;;  %v884_v53 = vpop.f32.mrf.mxu2  ;;  %v913_v54 = vpop.f32.mrf.mxu3  ;;  %v350_v50 = vld [vmem:[%s1723_s12 + $0x18] sm:$0xff]  ;;  %s1144_s12 = sshll.u32 %s1140_s25, 4  ;;  %s1145_s12 = int_to_ptr.hbm [resolvable:$true] %s1144_s12 }
 0x1fb   : > { %v885_v55 = vadd.f32 %v884_v53, %v816_v51 }
 0x1fc   : > { %v944_v57 = vsel %vm924_vm6, %v940_v52, 0.0 }
 0x1fd   : > { %v1038_v58 = vpack.c.bf16 %v944_v57, %v944_v57  ;;  %v914_v59 = vadd.f32 %v913_v54, %v885_v55 }
 0x1fe   : > { %v789_v61 = vpop.f32.mrf.mxu0 }
 0x1ff   : > { %v1424_v13 = vpop.eup %1423  ;;  %v1042_v62 = vunpack.c.l.bf16 %v1038_v58  ;;  %v957_v63 = vmax.f32 %v914_v59, 1e-30  ;;  %v818_v0 = vpop.f32.mrf.mxu1  ;;  %v1084_v2 = vunpack.c.l.b16 %v1038_v58  ;;  %vm946_vm8 = vcmp.gt.f32.partialorder %v914_v59, 0.0 }
 0x200   : > { %v961_v5 = vmul.f32 0.6931472, %v1424_v13  ;;  %v819_v7 = vadd.f32 %v818_v0, %v789_v61  ;;  %v996_v13 = vlaneseq }
 0x201   : > { %v1046_v6 = vsub.f32 %v944_v57, %v1042_v62  ;;  %1425 = vlog2.f32 %v957_v63  ;;  %v1086_v8 = vpack.c.b16 %v1084_v2, %v1083_v1 }
 0x202   : > { %v887_v9 = vpop.f32.mrf.mxu2  ;;  %v916_v10 = vpop.f32.mrf.mxu3  ;;  %v968_v12 = vsub.f32 %v952_v3, %v961_v5  ;;  %v997_v0 = vshrl.u32 %v996_v13, 7 }
 0x203   : > { %v888_v14 = vadd.f32 %v887_v9, %v819_v7  ;;  %1340 = vmatmul.msk.bf16.gmra.mxu1 %vm386_vm0, %v1086_v8  ;;  %v1048_v15 = vpack.c.bf16 %v1046_v6, %v1045_v4  ;;  %v1002_v7 = vstv %s1336_s20 }
 0x204   : > { %v972_v16 = vsel %vm945_vm7, %v968_v12, 0.0  ;;  %v998_v3 = vadd.s32 8, %v997_v0  ;;  %v999_v6 = vadd.s32 16, %v997_v0 }
 0x205   : > { %v917_v17 = vadd.f32 %v916_v10, %v888_v14  ;;  %1338 = vmatmul.msk.bf16.gmra.mxu0 %vm386_vm0, %v1048_v15  ;;  %v976_v21 = vmul.f32 %v972_v16, %v347_v11  ;;  %v1003_v10 = vadd.s32 %v1002_v7, %v997_v0 }
 0x206   : > { %v791_v18 = vpop.f32.mrf.mxu0  ;;  %v1004_v8 = vadd.s32 %v1002_v7, %v998_v3  ;;  %v1005_v11 = vadd.s32 %v1002_v7, %v999_v6 }
 0x207   : > { %v1426_v19 = vpop.eup %1425  ;;  %v958_v22 = vmax.f32 %v917_v17, 1e-30  ;;  %v820_v23 = vpop.f32.mrf.mxu1  ;;  %v980_v24 = vsel %vm386_vm0, %v976_v21, 0.0  ;;  %vm947_vm9 = vcmp.gt.f32.partialorder %v917_v17, 0.0  ;;  %v1000_v21 = vadd.s32 24, %v997_v0 }
 0x208   : > { %v963_v28 = vmul.f32 0.6931472, %v1426_v19  ;;  %981 = vadd.xlane.f32.xlu2 %v980_v24  ;;  %v821_v36 = vadd.f32 %v820_v23, %v791_v18  ;;  %vm1008_vm11 = vcmp.lt.s32.totalorder %v1004_v8, 64  ;;  %vm1007_vm12 = vcmp.lt.s32.totalorder %v1003_v10, 64 }
 0x209   : > { %1427 = vlog2.f32 %v958_v22  ;;  %vm1009_vm13 = vcmp.lt.s32.totalorder %v1005_v11, 64 }
 0x20a   : > { %v889_v29 = vpop.f32.mrf.mxu2  ;;  %v969_v30 = vsub.f32 %v953_v25, %v963_v28  ;;  %v918_v32 = vpop.f32.mrf.mxu3  ;;  %v1006_v25 = vadd.s32 %v1002_v7, %v1000_v21 }
 0x20b   : > { %v890_v31 = vadd.f32 %v889_v29, %v821_v36 }
 0x20c   : > { %v973_v33 = vsel %vm946_vm8, %v969_v30, 0.0  ;;  %vm1010_vm15 = vcmp.lt.s32.totalorder %v1006_v25, 64 }
 0x20d   : > { %v919_v34 = vadd.f32 %v918_v32, %v890_v31  ;;  %v977_v35 = vmul.f32 %v973_v33, %v348_v37 }
 0x20f   : > { %v1428_v38 = vpop.eup %1427  ;;  %v959_v39 = vmax.f32 %v919_v34, 1e-30  ;;  %v983_v42 = vsel %vm386_vm0, %v977_v35, 0.0  ;;  %vm948_vm10 = vcmp.gt.f32.partialorder %v919_v34, 0.0 }
 0x210   : > { %v965_v43 = vmul.f32 0.6931472, %v1428_v38  ;;  %984 = vadd.xlane.f32.xlu2 %v983_v42 }
 0x211   : > { %1429 = vlog2.f32 %v959_v39 }
 0x212   : > { %v970_v41 = vsub.f32 %v954_v27, %v965_v43 }
 0x214   : > { %v974_v44 = vsel %vm947_vm9, %v970_v41, 0.0 }
 0x215   : > { %v978_v45 = vmul.f32 %v974_v44, %v349_v40 }
 0x217   : > { %v1430_v46 = vpop.eup %1429  ;;  %v986_v47 = vsel %vm386_vm0, %v978_v45, 0.0 }
 0x218   : > { %v967_v49 = vmul.f32 0.6931472, %v1430_v46  ;;  %987 = vadd.xlane.f32.xlu0 %v986_v47 }
 0x21a   : > { %v971_v51 = vsub.f32 %v955_v48, %v967_v49 }
 0x21c   : > { %v975_v20 = vsel %vm948_vm10, %v971_v51, 0.0 }
 0x21d   : > { %v979_v52 = vmul.f32 %v975_v20, %v350_v50 }
 0x21f   : > { %v989_v53 = vsel %vm386_vm0, %v979_v52, 0.0 }
 0x220   : > { %990 = vadd.xlane.f32.xlu1 %v989_v53 }
 0x270   : > { %v1102_v54 = vpop.f32.mrf.mxu1 }
 0x272   : > { %v1067_v55 = vpop.f32.mrf.mxu0 }
 0x273   : > { %v1103_v56 = vadd.f32 %v1102_v54, %v1067_v55 }
 0x275   : > { %v1112_v57 = vmul.f32 1.442695, %v1103_v56 }
 0x277   : > { %1431 = vpow2.f32 %v1112_v57 }
 0x278   : > { %v1104_v58 = vpop.f32.mrf.mxu1 }
 0x27a   : > { %v1069_v59 = vpop.f32.mrf.mxu0 }
 0x27b   : > { %v1105_v26 = vadd.f32 %v1104_v58, %v1069_v59  ;;  %v982_v62 = vpop.xlane.xlu2 %981 }
 0x27c   : > { %v992_v18 = vsub.f32 0.0, %v982_v62 }
 0x27d   : > { %v1432_v60 = vpop.eup %1431  ;;  %v1114_v61 = vmul.f32 1.442695, %v1105_v26 }
 0x27e   : > { %1120 = vst.msk [vmem:[%s1743_s19] sm:$0xff] %vm386_vm0, %v1432_v60  ;;  %v1011_v28 = vsel %vm1007_vm12, %v992_v18, 0.0 }
 0x27f   : > { %1433 = vpow2.f32 %v1114_v61  ;;  %v1016_v37 = vsel %vm1015_vm14, %v1011_v28, 0.0 }
 0x280   : > { %v1107_v63 = vpop.f32.mrf.mxu1 }
 0x282   : > { %v1072_v1 = vpop.f32.mrf.mxu0 }
 0x283   : > { %v1108_v2 = vadd.f32 %v1107_v63, %v1072_v1  ;;  %v985_v9 = vpop.xlane.xlu2 %984 }
 0x284   : > { %v993_v12 = vsub.f32 0.0, %v985_v9 }
 0x285   : > { %v1434_v4 = vpop.eup %1433  ;;  %v1116_v5 = vmul.f32 1.442695, %v1108_v2 }
 0x286   : > { %1121 = vst.msk [vmem:[%s1743_s19 + $0x8] sm:$0xff] %vm386_vm0, %v1434_v4  ;;  %v1012_v24 = vsel %vm1008_vm11, %v993_v12, 0.0 }
 0x287   : > { %1435 = vpow2.f32 %v1116_v5  ;;  %v1017_v29 = vsel %vm1015_vm14, %v1012_v24, 0.0 }
 0x288   : > { %v1109_v14 = vpop.f32.mrf.mxu1  ;;  %v1018_v32 = vadd.f32 %v1017_v29, %v1016_v37 }
 0x28a   : > { %v1074_v15 = vpop.f32.mrf.mxu0 }
 0x28b   : > { %v1110_v16 = vadd.f32 %v1109_v14, %v1074_v15  ;;  %v988_v17 = vpop.xlane.xlu0 %987 }
 0x28c   : > { %v994_v19 = vsub.f32 0.0, %v988_v17 }
 0x28d   : > { %v1436_v22 = vpop.eup %1435  ;;  %v1118_v23 = vmul.f32 1.442695, %v1110_v16 }
 0x28e   : > { %1122 = vst.msk [vmem:[%s1743_s19 + $0x10] sm:$0xff] %vm386_vm0, %v1436_v22  ;;  %v1013_v36 = vsel %vm1009_vm13, %v994_v19, 0.0 }
 0x28f   : > { %1437 = vpow2.f32 %v1118_v23  ;;  %v1019_v30 = vsel %vm1015_vm14, %v1013_v36, 0.0 }
 0x290   : > { %v1020_v38 = vadd.f32 %v1019_v30, %v1018_v32 }
 0x293   : > { %v991_v31 = vpop.xlane.xlu1 %990 }
 0x294   : > { %v995_v33 = vsub.f32 0.0, %v991_v31 }
 0x295   : > { %v1438_v34 = vpop.eup %1437 }
 0x296   : > { %1123 = vst.msk [vmem:[%s1743_s19 + $0x18] sm:$0xff] %vm386_vm0, %v1438_v34  ;;  %v1014_v35 = vsel %vm1010_vm15, %v995_v33, 0.0  ;;  %s1453_s19 = sshra.s32 %s1145_s12, 4  ;;  %s1454_s19 = int_to_ptr.hbm [resolvable:$true] %s1453_s19 }
 0x297   : > { %v1021_v39 = vsel %vm1015_vm14, %v1014_v35, 0.0  ;;  %s1455_s20 = scalar_lea.hbm %s1454_s19, 8  ;;  %p1460_p0 = scmp.lt.s32.totalorder %s1454_s19, %s1793_s7 }
 0x298   : > { %v1022_v42 = vadd.f32 %v1021_v39, %v1020_v38  ;;  %p1456_p11 = scmp.ne.s32.totalorder %s1454_s19, %s1455_s20  ;;  %p1461_p1 = scmp.lt.s32.totalorder %s1459_s22, %s1455_s20 }
 0x29a   : > { %1023 = vadd.xlane.f32.xlu2 %v1022_v42  ;;  %p1457_p12 = pnand %p1456_p11, %p1587_p5  ;;  %p1462_p2 = por %p1461_p1, %p1460_p0 }
 0x29c   : > { %p1458_p13 = pneg %p1457_p12 }
 0x29e   : > { %p1463_p3 = pnand %p1462_p2, %p1458_p13 }
 0x30d   : > { %v1024_v27 = vpop.xlane.xlu2 %1023 }
 0x30e   : > { %v1025_v43 = vrot.slane %v1024_v27, 4 }
 0x310   : > { %v1026_v40 = vadd.f32 %v1025_v43, %v1024_v27 }
 0x312   : > { %v1027_v41 = vrot.slane %v1026_v40, 2 }
 0x314   : > { %v1028_v44 = vadd.f32 %v1027_v41, %v1026_v40 }
 0x316   : > { %v1029_v45 = vrot.slane %v1028_v44, 1 }
 0x318   : > { %v1030_v46 = vadd.f32 %v1029_v45, %v1028_v44 }
 0x31a   : > { %1363 = vpush %v1030_v46 }
 0x34b   : > { %s1364_s13 = spop %1363 }
 0x34c   : > { %v1032_v47 = vstv %s1364_s13 }
 0x34d   : > { %1033 = vst [vmem:[%s316_s26] sm:$0xff] %v1032_v47 }
 0x34e   : > { %1466 = shalt.err (!%p1463_p3)
}
 0x34f   : > { %1365 = dma.vmem_to_hbm [thread:$0]  (%p1587_p5), %s1143_s10, 128, %s1145_s12, %s1125_s17  }
 0x350 PF: > { %p1371_p4 = scmp.ge.s32.totalorder %s1501_s30, 2  ;;  %s1160_s18 = sand.u32 1, %s1489_s27  }
 0x351   : > { %s1161_s0 = scalar_lea.sflag [#allocation3], %s1160_s18 }
 0x352   : > { %p1368_p7 = pnand %p1371_p4, %p1591_p6 }
 0x354   : > { %p1369_p8 = pneg %p1368_p7 }
 0x356   : > { %1484 = dma.done.wait (%p1369_p8), %s1161_s0, 128  }
 0x357   : > { %1486 = vsyncadd (%p1369_p8), %s1161_s0, 4294967168  ;;  %p19_p9 = scmp.ge.s32.totalorder %s1574_s11, 4   ;;  %s1799_s27 = smov %s1493_s28 }
 0x358   : > { %s1800_s28 = smov %s1497_s29  ;;  %s1801_s29 = smov %s1585_s14 }
 0x359   : > { %s1802_s30 = smov %s1574_s11  ;;  %21 = sbr.rel (!%p19_p9) target bundleno = 5 (0x5), region = 98 }
 0x35e   :  { %1175 = vsyncpa [#allocation3], 1 }
 0x35f   :  { %1177 = vsyncpa [#allocation3 + $0x1], 1 }

</bundles_post_ra>
